<compile_context>
chip_gen: v6e
topology: v6e:2x2x1
jax: 0.10.0
libtpu: 0.0.40
codegen_flags: <defaults>
</compile_context>

<pallas_src>
import math

import jax
import jax.numpy as jnp
from jax.experimental import pallas as pl
from jax.experimental.pallas import tpu as pltpu

_LANE = 128
_TARGET_BLOCK_BYTES = 2 * 1024 * 1024  # ~2 MiB/block -> ~8 MiB VMEM w/ double buffers


def _drop_path_kernel(scale_ref, x_ref, o_ref):
    # scale_ref: (B,) float32 in SMEM (scalar prefetch), per-sample 0 or 1/keep_prob
    # x_ref / o_ref: (1, tr, 128) VMEM tile of the flattened, lane-dense input
    s = scale_ref[pl.program_id(0)]
    o_ref[...] = (x_ref[...].astype(jnp.float32) * s).astype(o_ref.dtype)


def drop_path(x, drop_prob: float = 0.0, training: bool = False, *, key=None):
    """Pallas implementation of timm-style drop_path. x: (B, ...)."""
    if drop_prob == 0.0 or not training:
        return x
    if key is None:
        # TODO(synk): PyTorch uses a stateful global RNG; callers should pass a
        # fresh key every step, otherwise the same samples are dropped each call.
        key = jax.random.PRNGKey(0)

    orig_shape = x.shape
    B = orig_shape[0]
    F = math.prod(orig_shape[1:])
    if B == 0 or F == 0:
        return x

    keep_prob = 1.0 - float(drop_prob)
    rand = jax.random.uniform(key, (B,), dtype=jnp.float32)
    mask = jnp.floor(keep_prob + rand)                  # 0.0 or 1.0 per sample
    scale = (mask / keep_prob).astype(jnp.float32)      # keep f32; cast product only

    # Flatten to a lane-dense (B, R, 128) slab (pad feature dim if needed).
    itemsize = jnp.dtype(x.dtype).itemsize
    R = pl.cdiv(F, _LANE)
    Fp = R * _LANE
    x2 = x.reshape(B, F)
    if Fp != F:
        x2 = jnp.pad(x2, ((0, 0), (0, Fp - F)))
    x3 = x2.reshape(B, R, _LANE)

    # Row tile: ~2 MiB per block, a multiple of 8 sublanes (or the whole R).
    target_rows = max(8, (_TARGET_BLOCK_BYTES // (_LANE * itemsize)) // 8 * 8)
    tr = R if R <= target_rows else target_rows
    grid = (B, pl.cdiv(R, tr))

    out3 = pl.pallas_call(
        _drop_path_kernel,
        out_shape=jax.ShapeDtypeStruct((B, R, _LANE), x.dtype),
        grid_spec=pltpu.PrefetchScalarGridSpec(
            num_scalar_prefetch=1,
            grid=grid,
            in_specs=[pl.BlockSpec((1, tr, _LANE), lambda b, c, sc: (b, c, 0))],
            out_specs=pl.BlockSpec((1, tr, _LANE), lambda b, c, sc: (b, c, 0)),
        ),
        compiler_params=pltpu.CompilerParams(
            dimension_semantics=("parallel", "parallel")),
        cost_estimate=pl.CostEstimate(
            flops=B * Fp, transcendentals=0,
            bytes_accessed=2 * B * Fp * itemsize),
    )(scale, x3)

    out = out3.reshape(B, Fp)
    if Fp != F:
        out = out[:, :F]
    return out.reshape(orig_shape)


class DropPath:
    """Drop paths (Stochastic Depth) per sample — Pallas/JAX version."""

    def __init__(self, drop_prob=None):
        self.drop_prob = 0.0 if drop_prob is None else float(drop_prob)
        self.training = True

    def __call__(self, x, key=None):
        return drop_path(x, self.drop_prob, self.training, key=key)


def _reference(x, drop_prob, key):
    keep_prob = 1.0 - drop_prob
    B = x.shape[0]
    rand = jax.random.uniform(key, (B,), dtype=jnp.float32)
    mask = jnp.floor(keep_prob + rand)
    scale = (mask / keep_prob).reshape((B,) + (1,) * (x.ndim - 1))
    return (x.astype(jnp.float32) * scale).astype(x.dtype)


if __name__ == "__main__":
    key = jax.random.PRNGKey(0)
    kx, kmask, kx2, kmask2 = jax.random.split(key, 4)

    # Test 1: ViT-like shape (B, N, D), D*N a multiple of 128 (no padding path)
    B, N, D = 2, 8, 32
    x = jax.random.normal(kx, (B, N, D), dtype=jnp.float32)
    drop_prob = 0.25
    module = DropPath(drop_prob)
    module.training = True

    out = jax.block_until_ready(module(x, key=kmask))
    ref = _reference(x, drop_prob, kmask)
    assert out.shape == x.shape and out.dtype == x.dtype
    assert jnp.allclose(out, ref, atol=1e-6), "mismatch vs reference (test 1)"

    # Test 2: non-128-aligned feature count exercises pad/slice path
    x_odd = jax.random.normal(kx2, (2, 7, 33), dtype=jnp.float32)
    out_odd = jax.block_until_ready(drop_path(x_odd, 0.5, True, key=kmask2))
    ref_odd = _reference(x_odd, 0.5, kmask2)
    assert out_odd.shape == x_odd.shape
    assert jnp.allclose(out_odd, ref_odd, atol=1e-6), "mismatch vs reference (test 2)"

    # Eval mode: identity
    module.training = False
    out_eval = jax.block_until_ready(module(x, key=kmask))
    assert jnp.allclose(out_eval, x)

    print("KERNEL_OK")
</pallas_src>

<mosaic_0001>
module attributes {stable_mosaic.version = 11 : i64} {
  func.func @_drop_path_kernel(%arg0: i32, %arg1: i32, %arg2: memref<2xf32, #tpu.memory_space<smem>>, %arg3: memref<1x2x128xf32, #tpu.memory_space<vmem>>, %arg4: memref<1x2x128xf32, #tpu.memory_space<vmem>>) attributes {dimension_semantics = [#tpu.dimension_semantics<parallel>, #tpu.dimension_semantics<parallel>], iteration_bounds = array<i64: 2, 1>, scalar_prefetch = 1 : i64, scratch_operands = 0 : i64, tpu.core_type = #tpu.core_type<tc>, window_params = [{transform_indices = @transform_0, window_bounds = array<i64: 1, 2, 128>}, {transform_indices = @transform_1, window_bounds = array<i64: 1, 2, 128>}]} {
    %0 = arith.index_cast %arg0 : i32 to index
    %1 = memref.load %arg2[%0] : memref<2xf32, #tpu.memory_space<smem>>
    %c0 = arith.constant 0 : index
    %c0_0 = arith.constant 0 : index
    %c0_1 = arith.constant 0 : index
    %2 = vector.load %arg3[%c0, %c0_0, %c0_1] : memref<1x2x128xf32, #tpu.memory_space<vmem>>, vector<1x2x128xf32>
    %3 = vector.broadcast %1 : f32 to vector<1x2x128xf32>
    %4 = arith.mulf %2, %3 : vector<1x2x128xf32>
    %c0_2 = arith.constant 0 : index
    %c0_3 = arith.constant 0 : index
    %c0_4 = arith.constant 0 : index
    %5 = vector.load %arg4[%c0_2, %c0_3, %c0_4] : memref<1x2x128xf32, #tpu.memory_space<vmem>>, vector<1x2x128xf32>
    tpu.vector_store %arg4[%c0_2, %c0_3, %c0_4], %4 {strides = array<i32>} : memref<1x2x128xf32, #tpu.memory_space<vmem>>, vector<1x2x128xf32>,
    return
  }
  func.func @transform_0(%arg0: i32, %arg1: i32, %arg2: memref<2xf32, #tpu.memory_space<smem>>) -> (i32, i32, i32) {
    %c0_i32 = arith.constant 0 : i32
    %c0_i32_0 = arith.constant 0 : i32
    return %arg0, %arg1, %c0_i32 : i32, i32, i32
  }
  func.func @transform_1(%arg0: i32, %arg1: i32, %arg2: memref<2xf32, #tpu.memory_space<smem>>) -> (i32, i32, i32) {
    %c0_i32 = arith.constant 0 : i32
    %c0_i32_0 = arith.constant 0 : i32
    return %arg0, %arg1, %c0_i32 : i32, i32, i32
  }
}

</mosaic_0001>

<bundles_post_ra>
// kernel: tpu_custom_call.1
= control target key start
LH: loop header
LB: loop body
LE: loop exit
PB: predicated region body
PF: predicated region fallthrough
CT: control target
= control target key end

     0   :  { %s450_s9 = smov [#allocation3]   ;;  %s606_s0 = inlined_call_operand.hbm [shape: f32[2], index: 0, kind: input, shape index: {}]   ;;  %s607_s1 = inlined_call_operand.hbm [shape: f32[2,2,128], index: 1, kind: input, shape index: {}]   ;;  %s608_s2 = inlined_call_operand.hbm [shape: f32[2,2,128], index: 2, kind: output, shape index: {}]  }
   0x1   :  { %8 = dma.hbm_to_smem %s606_s0, 16, %s450_s9, [#allocation2] }
   0x2   :  { %416 = dma.done.wait [#allocation2], 16 }
   0x3   :  { %417 = vsyncadd [#allocation2], 4294967280 }
   0x4   :  { %10 = sfence }
   0x5   :  { %11 = vsyncpa [#allocation5], 0 }
   0x6   :  { %13 = vsyncpa [#allocation5 + $0x1], 0 }
   0x7   :  { %14 = vsyncpa [#allocation6], 0 }
   0x8   :  { %16 = vsyncpa [#allocation6 + $0x1], 0  ;;  %s471_s12 = smov 0   ;;  %s473_s13 = smov 0  }
   0x9   :  { %s475_s14 = smov 0   ;;  %s477_s15 = smov 0  }
   0xa   :  { %s479_s16 = smov 0   ;;  %s481_s17 = smov 0  }
   0xb LB: > { %s254_s0 = sadd.s32 4294967295, %s448_s17   ;;  %s255_s18 = sadd.s32 4294967294, %s448_s17   ;;  %s448_s17 = sphi %s481_s17, %s22_s17   ;;  %s444_s16 = sphi %s479_s16, %s620_s16   ;;  %s440_s15 = sphi %s477_s15, %s619_s15   ;;  %s436_s14 = sphi %s475_s14, %s618_s14   ;;  %s432_s13 = sphi %s473_s13, %s617_s13   ;;  %s428_s12 = sphi %s471_s12, %s616_s12  }
   0xc   : > { %s34_s19 = sadd.s32 1, %s444_s16  ;;  %s43_s20 = sadd.s32 1, %s436_s14 }
   0xd   : > { %p36_p0 = scmp.ge.s32.totalorder %s34_s19, 2  ;;  %p50_p1 = scmp.ne.s32.totalorder %s436_s14, %s432_s13 }
   0xe   : > { %p51_p2 = scmp.eq.s32.totalorder %s448_s17, 0  ;;  %p56_p3 = scmp.ne.s32.totalorder %s432_s13, %s428_s12 }
   0xf   : > { %s622_s19 = smov (%p36_p0, %s34_s19), 0  ;;  %p57_p5 = scmp.eq.s32.totalorder %s254_s0, 0 }
  0x10   : > { %p512_p4 = por %p51_p2, %p50_p1  ;;  %s38_s22 = ssub.s32 %s444_s16, %s622_s19 }
  0x11   : > { %p82_p6 = scmp.eq.s32.totalorder %s254_s0, 1  ;;  %p41_p7 = scmp.eq.s32.totalorder %s38_s22, 0 }
  0x12   : > { %p518_p8 = por %p57_p5, %p56_p3  ;;  %p88_p10 = scmp.eq.s32.totalorder %s255_s18, 1 }
  0x13   : > { %p522_p9 = por %p82_p6, %p50_p1  ;;  %p279_p13 = scmp.lt.s32.totalorder %s448_s17, 2 }
  0x14   : > { %s527_s25 = scalar_select %p41_p7, %s436_s14, %s43_s20  }
  0x15   : > { %p529_p11 = por %p88_p10, %p56_p3  ;;  %s108_s27 = sand.u32 1, %s436_s14  }
  0x16   : > { %s258_s28 = sshll.u32 %s108_s27, 1  ;;  %s259_s29 = sshll.u32 %s444_s16, 5 }
  0x17   : > { %s612_s26 = scalar_select %p529_p11, 1, 0 }
  0x18   : > { %s118_s4 = scalar_lea.hbm %s607_s1, %s259_s29  ;;  %s112_s5 = scalar_lea.vmem [#allocation4], %s258_s28 }
  0x19   : > { %s120_s6 = sshll.u32 %s112_s5, 4  ;;  %p542_p0 = pnand %p279_p13, %p512_p4  ;;  %s121_s6 = int_to_ptr.vmem [resolvable:$true] %s120_s6 }
  0x1a   : > { %p260_p1 = scmp.ge.s32.totalorder %s448_s17, 1  ;;  %p125_p2 = scmp.lt.s32.totalorder %s448_s17, 3 }
  0x1b   : > { %s109_s8 = scalar_lea.sflag [#allocation5], %s108_s27  ;;  %p340_p3 = pneg %p542_p0 }
  0x1c   : > { %s351_s9 = scalar_lea.vmem %s121_s6, 32  ;;  %s451_s10 = smov [#allocation4]  }
  0x1d   : > { %p352_p5 = scmp.ne.s32.totalorder %s121_s6, %s351_s9  ;;  %s356_s11 = sshll.u32 %s451_s10, 4  ;;  %s357_s11 = int_to_ptr.vmem [resolvable:$false] %s356_s11 }
  0x1e   : > { %s358_s0 = scalar_lea.vmem %s357_s11, 64  ;;  %p359_p10 = scmp.lt.s32.totalorder %s121_s6, %s357_s11 }
  0x1f   : > { %p354_p6 = pnand %p352_p5, %p340_p3  ;;  %p360_p12 = scmp.lt.s32.totalorder %s358_s0, %s351_s9 }
  0x21   : > { %p355_p7 = pneg %p354_p6  ;;  %p361_p4 = por %p360_p12, %p359_p10 }
  0x23   : > { %p362_p13 = pnand %p361_p4, %p355_p7 }
  0x25   : > { %365 = shalt.err (!%p362_p13)
}
  0x26   : > { %274 = dma.hbm_to_vmem [thread:$0]  (!%p542_p0), %s118_s4, 32, %s121_s6, %s109_s8  }
  0x27   : > { %p126_p11 = pnand %p260_p1, %p125_p2 }
  0x28   : > { %s557_s18 = sand.u32 (!%p126_p11), 1, %s432_s13  }
  0x29   : > { %129 = sbr.rel (%p126_p11) target bundleno = 71 (0x47), region = 24  ;;  %s261_s20 = sshll.u32 (!%p126_p11), %s557_s18, 1 }
  0x2a   : > { %s132_s21 = scalar_lea.sflag (!%p126_p11), [#allocation5], %s557_s18  ;;  %s135_s22 = scalar_lea.vmem (!%p126_p11), [#allocation4], %s261_s20 }
  0x2e   : > { %419 = dma.done.wait (%p518_p8), %s132_s21, 32  }
  0x2f   : > { %421 = vsyncadd (%p518_p8), %s132_s21, 4294967264  ;;  %s154_s27 = sld [smem:[#allocation3 + %s440_s15]]  ;;  %s153_s28 = scalar_lea.vmem [#allocation7], %s261_s20  ;;  %v155_v0 = vld [vmem:[%s135_s22] sm:$0x3] }
  0x30   : > { %s174_s29 = sshll.u32 %s153_s28, 4  ;;  %s264_s30 = sshll.u32 %s440_s15, 5  ;;  %s175_s29 = int_to_ptr.vmem [resolvable:$true] %s174_s29 }
  0x31   : > { %s172_s5 = scalar_lea.hbm %s608_s2, %s264_s30  ;;  %s160_s6 = scalar_lea.sflag [#allocation6], %s557_s18 }
  0x32   : > { %s366_s23 = scalar_lea.vmem %s175_s29, 32  ;;  %s452_s7 = smov [#allocation7]  }
  0x33   : > { %p367_p8 = scmp.ne.s32.totalorder %s175_s29, %s366_s23  ;;  %s370_s8 = sshll.u32 %s452_s7, 4  ;;  %s371_s8 = int_to_ptr.vmem [resolvable:$false] %s370_s8 }
  0x34   : > { %s372_s9 = scalar_lea.vmem %s371_s8, 64  ;;  %p373_p0 = scmp.lt.s32.totalorder %s175_s29, %s371_s8 }
  0x35   : > { %v156_v1 = vstv %s154_s27  ;;  %p368_p11 = pnand %p367_p8, %p522_p9  ;;  %p374_p1 = scmp.lt.s32.totalorder %s372_s9, %s366_s23 }
  0x36   : > { %v157_v2 = vmul.f32 %v156_v1, %v155_v0 }
  0x37   : > { %p369_p12 = pneg %p368_p11  ;;  %p375_p2 = por %p374_p1, %p373_p0 }
  0x38   : > { %158 = vst [vmem:[%s153_s28] sm:$0x3] %v157_v2 }
  0x39   : > { %p376_p3 = pnand %p375_p2, %p369_p12 }
  0x3b   : > { %379 = shalt.err (!%p376_p3)
}
  0x3c   : > { %s380_s15 = scalar_lea.hbm %s172_s5, 32  ;;  %s384_s0 = scalar_lea.hbm %s608_s2, 64 }
  0x3d   : > { %p381_p5 = scmp.ne.s32.totalorder %s172_s5, %s380_s15  ;;  %p385_p10 = scmp.lt.s32.totalorder %s172_s5, %s608_s2 }
  0x3e   : > { %p386_p4 = scmp.lt.s32.totalorder %s384_s0, %s380_s15 }
  0x3f   : > { %p382_p6 = pnand %p381_p5, %p522_p9 }
  0x40   : > { %p387_p13 = por %p386_p4, %p385_p10 }
  0x41   : > { %p383_p7 = pneg %p382_p6 }
  0x43   : > { %p388_p8 = pnand %p387_p13, %p383_p7 }
  0x45   : > { %391 = shalt.err (!%p388_p8)
}
  0x46   : > { %269 = dma.vmem_to_hbm [thread:$0]  (%p522_p9), %s175_s29, 32, %s172_s5, %s160_s6  }
  0x47 PF: > { %s186_s21 = sand.u32 1, %s428_s12   ;;  %p614_p11 = scmp.ne.s32.totalorder %s612_s26, 0 }
  0x48   : > { %p615_p12 = scmp.ge.s32.totalorder %s448_s17, 2  ;;  %s187_s22 = scalar_lea.sflag [#allocation6], %s186_s21 }
  0x4a   : > { %p276_p0 = pnand %p615_p12, %p614_p11 }
  0x4c   : > { %p277_p1 = pneg %p276_p0 }
  0x4e   : > { %423 = dma.done.wait (%p277_p1), %s187_s22, 32  }
  0x4f   : > { %425 = vsyncadd (%p277_p1), %s187_s22, 4294967264  ;;  %s22_s17 = sadd.s32 1, %s448_s17   ;;  %s616_s12 = smov %s432_s13 }
  0x50   : > { %p19_p2 = scmp.ge.s32.totalorder %s22_s17, 4   ;;  %s617_s13 = smov %s436_s14 }
  0x51   : > { %s618_s14 = smov %s527_s25  ;;  %s619_s15 = smov %s444_s16 }
  0x52   : > { %s620_s16 = smov %s622_s19  ;;  %21 = sbr.rel (!%p19_p2) target bundleno = 11 (0xb), region = 69 }
  0x57   :  { %192 = vsyncpa [#allocation5], 1 }
  0x58   :  { %194 = vsyncpa [#allocation5 + $0x1], 1 }
  0x59   :  { %195 = vsyncpa [#allocation6], 1 }
  0x5a   :  { %197 = vsyncpa [#allocation6 + $0x1], 1 }

</bundles_post_ra>
